<compile_context>
chip_gen: v7x
topology: tpu7x:2x2x1
jax: 0.10.0
libtpu: 0.0.40
codegen_flags: <defaults>
</compile_context>

<pallas_src>
import functools

import jax
import jax.numpy as jnp
import numpy as np
from jax.experimental import pallas as pl
from jax.experimental.pallas import tpu as pltpu


def _basic_block_kernel(x_ref, w1_ref, w2_ref, b_ref, out_ref, rs_ref, y_ref,
                        *, H, W):
    """Fused BasicBlock forward for one group of Nb sublane-packed images.

    x_ref  : (1, Nb*C, P)        zero-padded input images, P=(H+2)*(W+2), rows
                                 of the padded image flattened on lanes.
    w*_ref : (3, Nb*C, 3*Nb*C)   conv weights grouped by dx, per-image block
                                 diagonal, BN scale folded in.
    b_ref  : (Nb*C, 2)           folded BN biases (col 0: bn1, col 1: bn2).
    out_ref: (1, Nb*C, H*(W+2))  output band; wrapper strips columns >= W.
    rs_ref : (3*Nb*C, H*(W+2))   row-shifted source stack (shared "im2col").
    y_ref  : (Nb*C, P)           zero-padded conv2 input image.
    """
    NbC = x_ref.shape[1]
    W2 = W + 2
    P = (H + 2) * W2
    Lc = H * W2 - 2            # contiguous band covering every output pixel
    M = W2 + 1                 # margin of the padded flat image before band
    cdt = rs_ref.dtype

    # Interior-column mask for the band: band index i sits at padded column
    # (i + 1) mod W2; columns 0 and W+1 are the zero border.
    pcol = (jax.lax.broadcasted_iota(jnp.int32, (1, Lc), 1) + 1) % W2
    mask = ((pcol >= 1) & (pcol <= W)).astype(jnp.float32)

    def conv3x3(read_row_band, w_ref):
        # 3 row-shifted stacks (dy = -1, 0, +1): one wide (Nb*C, H*W2) store
        # each.  The +/-1 column shifts are 1-lane-offset slices of rs_ref
        # (lane rotations on the load path), so no 9-slab im2col.
        for dyi in range(3):
            rs_ref[dyi * NbC:(dyi + 1) * NbC, :] = read_row_band(dyi)
        acc = jnp.dot(w_ref[0], rs_ref[:, 0:Lc],
                      preferred_element_type=jnp.float32)
        acc += jnp.dot(w_ref[1], rs_ref[:, 1:1 + Lc],
                       preferred_element_type=jnp.float32)
        acc += jnp.dot(w_ref[2], rs_ref[:, 2:2 + Lc],
                       preferred_element_type=jnp.float32)
        return acc

    # ---- conv1 -> bn1 (bias only; scale folded) -> relu -> zero borders ----
    z1 = conv3x3(lambda dyi: x_ref[0, :, dyi * W2:dyi * W2 + Lc + 2], w1_ref)
    z1 = jnp.maximum(z1 + b_ref[:, 0:1], 0.0) * mask

    # Assemble the zero-padded conv2 input: two small margin stores plus one
    # wide interior store (no full-buffer zeroing, no double writes).
    zmar = jnp.zeros((NbC, M), cdt)
    y_ref[:, 0:M] = zmar
    y_ref[:, M + Lc:P] = zmar
    y_ref[:, M:M + Lc] = z1.astype(cdt)

    # ---- conv2 -> bn2 (bias) -> + residual -> relu --------------------------
    z2 = conv3x3(lambda dyi: y_ref[:, dyi * W2:dyi * W2 + Lc + 2], w2_ref)
    res = x_ref[0, :, M:M + Lc].astype(jnp.float32)   # padded residual band
    o = jnp.maximum(z2 + b_ref[:, 1:2] + res, 0.0)

    # Lane-dense output store starting at lane 0; the two trailing band lanes
    # (always stripped by the wrapper) are zeroed for determinism.
    out_ref[0, :, 0:Lc] = o.astype(out_ref.dtype)
    out_ref[0, :, Lc:Lc + 2] = jnp.zeros((NbC, 2), out_ref.dtype)


@jax.jit
def basic_block_forward(x_nchw, w1, w2, s1, b1, s2, b2):
    """BasicBlock forward.  x_nchw: (N, C, H, W), w1/w2: (3,3,Cin,Cout) HWIO,
    s*/b*: (1, C) folded (eval-mode) BatchNorm scale/bias."""
    N, C, H, W = x_nchw.shape
    Cin, Cout = w1.shape[2], w1.shape[3]
    assert Cin == C and Cout == C, "downsample=None requires inplanes == planes"

    dtype = x_nchw.dtype
    W2 = W + 2
    P = (H + 2) * W2
    Lc = H * W2 - 2
    HW2 = H * W2

    # Pack Nb images per grid step so Nb*C fills the 8 f32 sublanes, while
    # keeping several grid steps for pipeline depth.
    nb = max(1, 8 // max(C, 1))
    while N % nb:
        nb -= 1
    NbC = nb * C
    G = N // nb

    # One wrapper-side zero pad (single HBM pass); the reshapes are free
    # contiguous merges, so the kernel block is the already-padded image.
    xp = jnp.pad(x_nchw, ((0, 0), (0, 0), (1, 1), (1, 1)))
    xp = xp.reshape(G, NbC, P)

    # Fold BN scale into the conv weights and group taps by dx with a
    # per-image block-diagonal layout:
    #   Wg[dx, n*C+co, dy*Nb*C + m*C + ci] = (n==m) * scale[co] * w[dy,dx,ci,co]
    eye = jnp.eye(nb, dtype=jnp.float32)

    def fold(w, s):
        ws = w.astype(jnp.float32) * s[0]                 # scale folded on co
        t = jnp.einsum('nm,yxio->xnoymi', eye, ws)        # (3,Nb,C,3,Nb,C)
        return t.reshape(3, NbC, 3 * NbC).astype(dtype)

    w1g, w2g = fold(w1, s1), fold(w2, s2)
    bias = jnp.stack([jnp.tile(b1[0], nb), jnp.tile(b2[0], nb)],
                     axis=1).astype(jnp.float32)          # (Nb*C, 2)

    kernel = functools.partial(_basic_block_kernel, H=H, W=W)
    out = pl.pallas_call(
        kernel,
        out_shape=jax.ShapeDtypeStruct((G, NbC, HW2), dtype),
        grid_spec=pltpu.PrefetchScalarGridSpec(
            num_scalar_prefetch=0,
            grid=(G,),
            in_specs=[
                pl.BlockSpec((1, NbC, P), lambda g: (g, 0, 0)),
                pl.BlockSpec((3, NbC, 3 * NbC), lambda g: (0, 0, 0)),
                pl.BlockSpec((3, NbC, 3 * NbC), lambda g: (0, 0, 0)),
                pl.BlockSpec((NbC, 2), lambda g: (0, 0)),
            ],
            out_specs=pl.BlockSpec((1, NbC, HW2), lambda g: (g, 0, 0)),
            scratch_shapes=[
                pltpu.VMEM((3 * NbC, Lc + 2), dtype),   # row-shifted source stack
                pltpu.VMEM((NbC, P), dtype),            # padded conv2 input image
            ],
        ),
        compiler_params=pltpu.CompilerParams(
            dimension_semantics=("parallel",)),
    )(xp, w1g, w2g, bias)

    # Strip the two padded columns with a single slice; reshapes are free.
    return out.reshape(N, C, H, W2)[..., :W]


def _reference_forward(x_nchw, w1, w2, s1, b1, s2, b2):
    """Pure-JAX reference (lax.conv) for correctness checking."""
    x = jnp.transpose(x_nchw, (0, 2, 3, 1))
    dn = jax.lax.conv_dimension_numbers(x.shape, w1.shape, ("NHWC", "HWIO", "NHWC"))
    conv = lambda inp, w: jax.lax.conv_general_dilated(
        inp, w, window_strides=(1, 1), padding="SAME", dimension_numbers=dn)
    y = conv(x, w1) * s1[0] + b1[0]
    y = jnp.maximum(y, 0.0)
    y = conv(y, w2) * s2[0] + b2[0]
    y = jnp.maximum(y + x, 0.0)
    return jnp.transpose(y, (0, 3, 1, 2))


def _fold_bn(gamma, beta, mean, var, eps=1e-5):
    scale = gamma / jnp.sqrt(var + eps)
    bias = beta - mean * scale
    return scale[None, :], bias[None, :]               # (1, C)


if __name__ == "__main__":
    key = jax.random.PRNGKey(0)
    N, C, H, W = 8, 4, 16, 16                          # inplanes = planes = 4

    keys = jax.random.split(key, 11)
    x = jax.random.normal(keys[0], (N, C, H, W), jnp.float32)

    # Conv weights (HWIO), deterministic init.
    w1 = jax.random.normal(keys[1], (3, 3, C, C), jnp.float32) * 0.1
    w2 = jax.random.normal(keys[2], (3, 3, C, C), jnp.float32) * 0.1

    # BatchNorm parameters (eval/inference form), deterministic init.
    g1 = 1.0 + 0.1 * jax.random.normal(keys[3], (C,), jnp.float32)
    be1 = 0.1 * jax.random.normal(keys[4], (C,), jnp.float32)
    m1 = 0.1 * jax.random.normal(keys[5], (C,), jnp.float32)
    v1 = jnp.abs(jax.random.normal(keys[6], (C,), jnp.float32)) + 0.5
    g2 = 1.0 + 0.1 * jax.random.normal(keys[7], (C,), jnp.float32)
    be2 = 0.1 * jax.random.normal(keys[8], (C,), jnp.float32)
    m2 = 0.1 * jax.random.normal(keys[9], (C,), jnp.float32)
    v2 = jnp.abs(jax.random.normal(keys[10], (C,), jnp.float32)) + 0.5

    s1, b1 = _fold_bn(g1, be1, m1, v1)
    s2, b2 = _fold_bn(g2, be2, m2, v2)

    out = basic_block_forward(x, w1, w2, s1, b1, s2, b2)
    out = jax.block_until_ready(out)

    ref = _reference_forward(x, w1, w2, s1, b1, s2, b2)
    np.testing.assert_allclose(np.asarray(out), np.asarray(ref),
                               rtol=1e-4, atol=1e-4)
    assert out.shape == (N, C, H, W)
    print("KERNEL_OK")
</pallas_src>

<mosaic_0001>
module attributes {stable_mosaic.version = 11 : i64} {
  func.func @_basic_block_kernel(%arg0: i32, %arg1: memref<1x8x324xf32, #tpu.memory_space<vmem>>, %arg2: memref<3x8x24xf32, #tpu.memory_space<vmem>>, %arg3: memref<3x8x24xf32, #tpu.memory_space<vmem>>, %arg4: memref<8x2xf32, #tpu.memory_space<vmem>>, %arg5: memref<1x8x288xf32, #tpu.memory_space<vmem>>, %arg6: memref<24x288xf32, #tpu.memory_space<vmem>>, %arg7: memref<8x324xf32, #tpu.memory_space<vmem>>) attributes {dimension_semantics = [#tpu.dimension_semantics<parallel>], iteration_bounds = array<i64: 4>, scalar_prefetch = 0 : i64, scratch_operands = 2 : i64, tpu.core_type = #tpu.core_type<tc>, window_params = [{transform_indices = @transform_0, window_bounds = array<i64: 1, 8, 324>}, {pipeline_mode = #tpu.pipeline_mode<synchronous>, transform_indices = @transform_1, window_bounds = array<i64: 3, 8, 24>}, {pipeline_mode = #tpu.pipeline_mode<synchronous>, transform_indices = @transform_2, window_bounds = array<i64: 3, 8, 24>}, {pipeline_mode = #tpu.pipeline_mode<synchronous>, transform_indices = @transform_3, window_bounds = array<i64: 8, 2>}, {transform_indices = @transform_4, window_bounds = array<i64: 1, 8, 288>}]} {
    %0 = tpu.iota {dimensions = array<i32: 1>} : vector<1x286xi32>
    %c1_i32 = arith.constant 1 : i32
    %1 = vector.broadcast %c1_i32 : i32 to vector<1x286xi32>
    %2 = arith.addi %0, %1 : vector<1x286xi32>
    %c18_i32 = arith.constant 18 : i32
    %c0_i32 = arith.constant 0 : i32
    %3 = arith.cmpi eq, %c18_i32, %c0_i32 : i32
    %c1_i32_0 = arith.constant 1 : i32
    %4 = arith.select %3, %c1_i32_0, %c18_i32 : i32
    %5 = vector.broadcast %4 : i32 to vector<1x286xi32>
    %6 = arith.remsi %2, %5 : vector<1x286xi32>
    %c0_i32_1 = arith.constant 0 : i32
    %7 = vector.broadcast %c0_i32_1 : i32 to vector<1x286xi32>
    %8 = arith.cmpi ne, %6, %7 : vector<1x286xi32>
    %c0_i32_2 = arith.constant 0 : i32
    %9 = vector.broadcast %c0_i32_2 : i32 to vector<1x286xi32>
    %10 = arith.cmpi slt, %6, %9 : vector<1x286xi32>
    %c0_i32_3 = arith.constant 0 : i32
    %11 = arith.cmpi slt, %4, %c0_i32_3 : i32
    %12 = vector.broadcast %11 : i1 to vector<1x286xi1>
    %13 = vector.broadcast %12 : vector<1x286xi1> to vector<1x286xi1>
    %14 = arith.xori %10, %13 : vector<1x286xi1>
    %15 = arith.andi %14, %8 : vector<1x286xi1>
    %16 = vector.broadcast %4 : i32 to vector<1x286xi32>
    %17 = arith.addi %6, %16 : vector<1x286xi32>
    %18 = arith.select %15, %17, %6 : vector<1x286xi1>, vector<1x286xi32>
    %c1_i32_4 = arith.constant 1 : i32
    %19 = vector.broadcast %c1_i32_4 : i32 to vector<1x286xi32>
    %20 = arith.cmpi sge, %18, %19 : vector<1x286xi32>
    %c16_i32 = arith.constant 16 : i32
    %21 = vector.broadcast %c16_i32 : i32 to vector<1x286xi32>
    %22 = arith.cmpi sle, %18, %21 : vector<1x286xi32>
    %23 = arith.andi %20, %22 : vector<1x286xi1>
    %24 = arith.extui %23 : vector<1x286xi1> to vector<1x286xi32>
    %25 = arith.sitofp %24 : vector<1x286xi32> to vector<1x286xf32>
    %c0 = arith.constant 0 : index
    %c0_5 = arith.constant 0 : index
    %c0_6 = arith.constant 0 : index
    %26 = vector.load %arg1[%c0, %c0_5, %c0_6] : memref<1x8x324xf32, #tpu.memory_space<vmem>>, vector<1x8x288xf32>
    %27 = vector.shape_cast %26 : vector<1x8x288xf32> to vector<8x288xf32>
    %c0_7 = arith.constant 0 : index
    %c0_8 = arith.constant 0 : index
    %28 = vector.load %arg6[%c0_7, %c0_8] : memref<24x288xf32, #tpu.memory_space<vmem>>, vector<8x288xf32>
    tpu.vector_store %arg6[%c0_7, %c0_8], %27 {strides = array<i32>} : memref<24x288xf32, #tpu.memory_space<vmem>>, vector<8x288xf32>,
    %c0_9 = arith.constant 0 : index
    %c0_10 = arith.constant 0 : index
    %c18 = arith.constant 18 : index
    %29 = vector.load %arg1[%c0_9, %c0_10, %c18] : memref<1x8x324xf32, #tpu.memory_space<vmem>>, vector<1x8x288xf32>
    %30 = vector.shape_cast %29 : vector<1x8x288xf32> to vector<8x288xf32>
    %c8 = arith.constant 8 : index
    %c0_11 = arith.constant 0 : index
    %31 = vector.load %arg6[%c8, %c0_11] : memref<24x288xf32, #tpu.memory_space<vmem>>, vector<8x288xf32>
    tpu.vector_store %arg6[%c8, %c0_11], %30 {strides = array<i32>} : memref<24x288xf32, #tpu.memory_space<vmem>>, vector<8x288xf32>,
    %c0_12 = arith.constant 0 : index
    %c0_13 = arith.constant 0 : index
    %c36 = arith.constant 36 : index
    %32 = vector.load %arg1[%c0_12, %c0_13, %c36] : memref<1x8x324xf32, #tpu.memory_space<vmem>>, vector<1x8x288xf32>
    %33 = vector.shape_cast %32 : vector<1x8x288xf32> to vector<8x288xf32>
    %c16 = arith.constant 16 : index
    %c0_14 = arith.constant 0 : index
    %34 = vector.load %arg6[%c16, %c0_14] : memref<24x288xf32, #tpu.memory_space<vmem>>, vector<8x288xf32>
    tpu.vector_store %arg6[%c16, %c0_14], %33 {strides = array<i32>} : memref<24x288xf32, #tpu.memory_space<vmem>>, vector<8x288xf32>,
    %c0_15 = arith.constant 0 : index
    %c0_16 = arith.constant 0 : index
    %c0_17 = arith.constant 0 : index
    %35 = vector.load %arg2[%c0_15, %c0_16, %c0_17] : memref<3x8x24xf32, #tpu.memory_space<vmem>>, vector<1x8x24xf32>
    %36 = vector.shape_cast %35 : vector<1x8x24xf32> to vector<8x24xf32>
    %c0_18 = arith.constant 0 : index
    %c0_19 = arith.constant 0 : index
    %37 = vector.load %arg6[%c0_18, %c0_19] : memref<24x288xf32, #tpu.memory_space<vmem>>, vector<24x286xf32>
    %cst = arith.constant dense<0.000000e+00> : vector<8x286xf32>
    %38 = tpu.matmul %36, %37, %cst {dimension_numbers = #tpu.dot_dimension_numbers<[1], [0], [0], [1], [0, 0, 1, 1], [], []>} : vector<8x24xf32>, vector<24x286xf32>, vector<8x286xf32> -> vector<8x286xf32>
    %c1 = arith.constant 1 : index
    %c0_20 = arith.constant 0 : index
    %c0_21 = arith.constant 0 : index
    %39 = vector.load %arg2[%c1, %c0_20, %c0_21] : memref<3x8x24xf32, #tpu.memory_space<vmem>>, vector<1x8x24xf32>
    %40 = vector.shape_cast %39 : vector<1x8x24xf32> to vector<8x24xf32>
    %c0_22 = arith.constant 0 : index
    %c1_23 = arith.constant 1 : index
    %41 = vector.load %arg6[%c0_22, %c1_23] : memref<24x288xf32, #tpu.memory_space<vmem>>, vector<24x286xf32>
    %cst_24 = arith.constant dense<0.000000e+00> : vector<8x286xf32>
    %42 = tpu.matmul %40, %41, %cst_24 {dimension_numbers = #tpu.dot_dimension_numbers<[1], [0], [0], [1], [0, 0, 1, 1], [], []>} : vector<8x24xf32>, vector<24x286xf32>, vector<8x286xf32> -> vector<8x286xf32>
    %43 = arith.addf %38, %42 : vector<8x286xf32>
    %c2 = arith.constant 2 : index
    %c0_25 = arith.constant 0 : index
    %c0_26 = arith.constant 0 : index
    %44 = vector.load %arg2[%c2, %c0_25, %c0_26] : memref<3x8x24xf32, #tpu.memory_space<vmem>>, vector<1x8x24xf32>
    %45 = vector.shape_cast %44 : vector<1x8x24xf32> to vector<8x24xf32>
    %c0_27 = arith.constant 0 : index
    %c2_28 = arith.constant 2 : index
    %46 = vector.load %arg6[%c0_27, %c2_28] : memref<24x288xf32, #tpu.memory_space<vmem>>, vector<24x286xf32>
    %cst_29 = arith.constant dense<0.000000e+00> : vector<8x286xf32>
    %47 = tpu.matmul %45, %46, %cst_29 {dimension_numbers = #tpu.dot_dimension_numbers<[1], [0], [0], [1], [0, 0, 1, 1], [], []>} : vector<8x24xf32>, vector<24x286xf32>, vector<8x286xf32> -> vector<8x286xf32>
    %48 = arith.addf %43, %47 : vector<8x286xf32>
    %c0_30 = arith.constant 0 : index
    %c0_31 = arith.constant 0 : index
    %49 = vector.load %arg4[%c0_30, %c0_31] : memref<8x2xf32, #tpu.memory_space<vmem>>, vector<8x1xf32>
    %50 = vector.broadcast %49 : vector<8x1xf32> to vector<8x286xf32>
    %51 = arith.addf %48, %50 : vector<8x286xf32>
    %cst_32 = arith.constant 0.000000e+00 : f32
    %52 = vector.broadcast %cst_32 : f32 to vector<8x286xf32>
    %53 = arith.maximumf %51, %52 : vector<8x286xf32>
    %54 = vector.broadcast %25 : vector<1x286xf32> to vector<8x286xf32>
    %55 = arith.mulf %53, %54 : vector<8x286xf32>
    %cst_33 = arith.constant 0.000000e+00 : f32
    %56 = vector.broadcast %cst_33 : f32 to vector<8x19xf32>
    %c0_34 = arith.constant 0 : index
    %c0_35 = arith.constant 0 : index
    %57 = vector.load %arg7[%c0_34, %c0_35] : memref<8x324xf32, #tpu.memory_space<vmem>>, vector<8x19xf32>
    tpu.vector_store %arg7[%c0_34, %c0_35], %56 {strides = array<i32>} : memref<8x324xf32, #tpu.memory_space<vmem>>, vector<8x19xf32>,
    %c0_36 = arith.constant 0 : index
    %c305 = arith.constant 305 : index
    %58 = vector.load %arg7[%c0_36, %c305] : memref<8x324xf32, #tpu.memory_space<vmem>>, vector<8x19xf32>
    tpu.vector_store %arg7[%c0_36, %c305], %56 {strides = array<i32>} : memref<8x324xf32, #tpu.memory_space<vmem>>, vector<8x19xf32>,
    %c0_37 = arith.constant 0 : index
    %c19 = arith.constant 19 : index
    %59 = vector.load %arg7[%c0_37, %c19] : memref<8x324xf32, #tpu.memory_space<vmem>>, vector<8x286xf32>
    tpu.vector_store %arg7[%c0_37, %c19], %55 {strides = array<i32>} : memref<8x324xf32, #tpu.memory_space<vmem>>, vector<8x286xf32>,
    %c0_38 = arith.constant 0 : index
    %c0_39 = arith.constant 0 : index
    %60 = vector.load %arg7[%c0_38, %c0_39] : memref<8x324xf32, #tpu.memory_space<vmem>>, vector<8x288xf32>
    %c0_40 = arith.constant 0 : index
    %c0_41 = arith.constant 0 : index
    %61 = vector.load %arg6[%c0_40, %c0_41] : memref<24x288xf32, #tpu.memory_space<vmem>>, vector<8x288xf32>
    tpu.vector_store %arg6[%c0_40, %c0_41], %60 {strides = array<i32>} : memref<24x288xf32, #tpu.memory_space<vmem>>, vector<8x288xf32>,
    %c0_42 = arith.constant 0 : index
    %c18_43 = arith.constant 18 : index
    %62 = vector.load %arg7[%c0_42, %c18_43] : memref<8x324xf32, #tpu.memory_space<vmem>>, vector<8x288xf32>
    %c8_44 = arith.constant 8 : index
    %c0_45 = arith.constant 0 : index
    %63 = vector.load %arg6[%c8_44, %c0_45] : memref<24x288xf32, #tpu.memory_space<vmem>>, vector<8x288xf32>
    tpu.vector_store %arg6[%c8_44, %c0_45], %62 {strides = array<i32>} : memref<24x288xf32, #tpu.memory_space<vmem>>, vector<8x288xf32>,
    %c0_46 = arith.constant 0 : index
    %c36_47 = arith.constant 36 : index
    %64 = vector.load %arg7[%c0_46, %c36_47] : memref<8x324xf32, #tpu.memory_space<vmem>>, vector<8x288xf32>
    %c16_48 = arith.constant 16 : index
    %c0_49 = arith.constant 0 : index
    %65 = vector.load %arg6[%c16_48, %c0_49] : memref<24x288xf32, #tpu.memory_space<vmem>>, vector<8x288xf32>
    tpu.vector_store %arg6[%c16_48, %c0_49], %64 {strides = array<i32>} : memref<24x288xf32, #tpu.memory_space<vmem>>, vector<8x288xf32>,
    %c0_50 = arith.constant 0 : index
    %c0_51 = arith.constant 0 : index
    %c0_52 = arith.constant 0 : index
    %66 = vector.load %arg3[%c0_50, %c0_51, %c0_52] : memref<3x8x24xf32, #tpu.memory_space<vmem>>, vector<1x8x24xf32>
    %67 = vector.shape_cast %66 : vector<1x8x24xf32> to vector<8x24xf32>
    %c0_53 = arith.constant 0 : index
    %c0_54 = arith.constant 0 : index
    %68 = vector.load %arg6[%c0_53, %c0_54] : memref<24x288xf32, #tpu.memory_space<vmem>>, vector<24x286xf32>
    %cst_55 = arith.constant dense<0.000000e+00> : vector<8x286xf32>
    %69 = tpu.matmul %67, %68, %cst_55 {dimension_numbers = #tpu.dot_dimension_numbers<[1], [0], [0], [1], [0, 0, 1, 1], [], []>} : vector<8x24xf32>, vector<24x286xf32>, vector<8x286xf32> -> vector<8x286xf32>
    %c1_56 = arith.constant 1 : index
    %c0_57 = arith.constant 0 : index
    %c0_58 = arith.constant 0 : index
    %70 = vector.load %arg3[%c1_56, %c0_57, %c0_58] : memref<3x8x24xf32, #tpu.memory_space<vmem>>, vector<1x8x24xf32>
    %71 = vector.shape_cast %70 : vector<1x8x24xf32> to vector<8x24xf32>
    %c0_59 = arith.constant 0 : index
    %c1_60 = arith.constant 1 : index
    %72 = vector.load %arg6[%c0_59, %c1_60] : memref<24x288xf32, #tpu.memory_space<vmem>>, vector<24x286xf32>
    %cst_61 = arith.constant dense<0.000000e+00> : vector<8x286xf32>
    %73 = tpu.matmul %71, %72, %cst_61 {dimension_numbers = #tpu.dot_dimension_numbers<[1], [0], [0], [1], [0, 0, 1, 1], [], []>} : vector<8x24xf32>, vector<24x286xf32>, vector<8x286xf32> -> vector<8x286xf32>
    %74 = arith.addf %69, %73 : vector<8x286xf32>
    %c2_62 = arith.constant 2 : index
    %c0_63 = arith.constant 0 : index
    %c0_64 = arith.constant 0 : index
    %75 = vector.load %arg3[%c2_62, %c0_63, %c0_64] : memref<3x8x24xf32, #tpu.memory_space<vmem>>, vector<1x8x24xf32>
    %76 = vector.shape_cast %75 : vector<1x8x24xf32> to vector<8x24xf32>
    %c0_65 = arith.constant 0 : index
    %c2_66 = arith.constant 2 : index
    %77 = vector.load %arg6[%c0_65, %c2_66] : memref<24x288xf32, #tpu.memory_space<vmem>>, vector<24x286xf32>
    %cst_67 = arith.constant dense<0.000000e+00> : vector<8x286xf32>
    %78 = tpu.matmul %76, %77, %cst_67 {dimension_numbers = #tpu.dot_dimension_numbers<[1], [0], [0], [1], [0, 0, 1, 1], [], []>} : vector<8x24xf32>, vector<24x286xf32>, vector<8x286xf32> -> vector<8x286xf32>
    %79 = arith.addf %74, %78 : vector<8x286xf32>
    %c0_68 = arith.constant 0 : index
    %c0_69 = arith.constant 0 : index
    %c19_70 = arith.constant 19 : index
    %80 = vector.load %arg1[%c0_68, %c0_69, %c19_70] : memref<1x8x324xf32, #tpu.memory_space<vmem>>, vector<1x8x286xf32>
    %81 = vector.shape_cast %80 : vector<1x8x286xf32> to vector<8x286xf32>
    %c0_71 = arith.constant 0 : index
    %c1_72 = arith.constant 1 : index
    %82 = vector.load %arg4[%c0_71, %c1_72] : memref<8x2xf32, #tpu.memory_space<vmem>>, vector<8x1xf32>
    %83 = vector.broadcast %82 : vector<8x1xf32> to vector<8x286xf32>
    %84 = arith.addf %79, %83 : vector<8x286xf32>
    %85 = arith.addf %84, %81 : vector<8x286xf32>
    %cst_73 = arith.constant 0.000000e+00 : f32
    %86 = vector.broadcast %cst_73 : f32 to vector<8x286xf32>
    %87 = arith.maximumf %85, %86 : vector<8x286xf32>
    %c0_74 = arith.constant 0 : index
    %c0_75 = arith.constant 0 : index
    %c0_76 = arith.constant 0 : index
    %88 = vector.load %arg5[%c0_74, %c0_75, %c0_76] : memref<1x8x288xf32, #tpu.memory_space<vmem>>, vector<1x8x286xf32>
    %89 = vector.shape_cast %88 : vector<1x8x286xf32> to vector<8x286xf32>
    %90 = vector.shape_cast %87 : vector<8x286xf32> to vector<1x8x286xf32>
    tpu.vector_store %arg5[%c0_74, %c0_75, %c0_76], %90 {strides = array<i32>} : memref<1x8x288xf32, #tpu.memory_space<vmem>>, vector<1x8x286xf32>,
    %cst_77 = arith.constant 0.000000e+00 : f32
    %91 = vector.broadcast %cst_77 : f32 to vector<8x2xf32>
    %c0_78 = arith.constant 0 : index
    %c0_79 = arith.constant 0 : index
    %c286 = arith.constant 286 : index
    %92 = vector.load %arg5[%c0_78, %c0_79, %c286] : memref<1x8x288xf32, #tpu.memory_space<vmem>>, vector<1x8x2xf32>
    %93 = vector.shape_cast %92 : vector<1x8x2xf32> to vector<8x2xf32>
    %94 = vector.shape_cast %91 : vector<8x2xf32> to vector<1x8x2xf32>
    tpu.vector_store %arg5[%c0_78, %c0_79, %c286], %94 {strides = array<i32>} : memref<1x8x288xf32, #tpu.memory_space<vmem>>, vector<1x8x2xf32>,
    return
  }
  func.func @transform_0(%arg0: i32) -> (i32, i32, i32) {
    %c0_i32 = arith.constant 0 : i32
    %c0_i32_0 = arith.constant 0 : i32
    %c0_i32_1 = arith.constant 0 : i32
    return %arg0, %c0_i32, %c0_i32_0 : i32, i32, i32
  }
  func.func @transform_1(%arg0: i32) -> (i32, i32, i32) {
    %c0_i32 = arith.constant 0 : i32
    %c0_i32_0 = arith.constant 0 : i32
    %c0_i32_1 = arith.constant 0 : i32
    %c0_i32_2 = arith.constant 0 : i32
    return %c0_i32, %c0_i32_0, %c0_i32_1 : i32, i32, i32
  }
  func.func @transform_2(%arg0: i32) -> (i32, i32, i32) {
    %c0_i32 = arith.constant 0 : i32
    %c0_i32_0 = arith.constant 0 : i32
    %c0_i32_1 = arith.constant 0 : i32
    %c0_i32_2 = arith.constant 0 : i32
    return %c0_i32, %c0_i32_0, %c0_i32_1 : i32, i32, i32
  }
  func.func @transform_3(%arg0: i32) -> (i32, i32) {
    %c0_i32 = arith.constant 0 : i32
    %c0_i32_0 = arith.constant 0 : i32
    %c0_i32_1 = arith.constant 0 : i32
    return %c0_i32, %c0_i32_0 : i32, i32
  }
  func.func @transform_4(%arg0: i32) -> (i32, i32, i32) {
    %c0_i32 = arith.constant 0 : i32
    %c0_i32_0 = arith.constant 0 : i32
    %c0_i32_1 = arith.constant 0 : i32
    return %arg0, %c0_i32, %c0_i32_0 : i32, i32, i32
  }
}

</mosaic_0001>

<bundles_post_ra>
// kernel: tile.13
= control target key start
LH: loop header
LB: loop body
LE: loop exit
PB: predicated region body
PF: predicated region fallthrough
CT: control target
= control target key end

     0   :  { %s22_s0 = inlined_call_operand.vmem [shape: f32[4], index: 0, kind: input, shape index: {}]   ;;  %s23_s1 = inlined_call_operand.vmem [shape: f32[2,4], index: 1, kind: output, shape index: {}]  }
   0x1   :  { %v4_v0 = vld [vmem:[%s22_s0] ss:$0 sm:$0xff] }
   0x2   :  { %5 = vst [vmem:[%s23_s1] sm:$0x3] %v4_v0 }

// kernel: tile.15
= control target key start
LH: loop header
LB: loop body
LE: loop exit
PB: predicated region body
PF: predicated region fallthrough
CT: control target
= control target key end

     0   :  { %vm7_vm0 = vcmask 31744   ;;  %vm13_vm1 = vcmask 64544   ;;  %s39_s0 = inlined_call_operand.vmem [shape: f32[2,4], index: 0, kind: input, shape index: {}]   ;;  %s40_s1 = inlined_call_operand.vmem [shape: f32[8,1], index: 1, kind: output, shape index: {}]  }
   0x1   :  { %v4_v0 = vld [vmem:[%s39_s0] sm:$0x3]  ;;  %s22_s0 = smov 4  }
   0x2   :  { %5 = vst [vmem:[#allocation1] sm:$0x3] %v4_v0 }
   0x9   :  { %v10_v1 = vld [vmem:[#allocation1 + $0x1] sm:$0x1]   ;;  %v6_v2 = vld [vmem:[#allocation1] sm:$0x1]  }
   0xa   :  { %11 = vrot.lane.b32.xlu0 %v10_v1, %s22_s0  ;;  %8 = vst.msk [vmem:[#allocation0] sm:$0x1] %vm7_vm0, %v6_v2  }
  0x7c   :  { %v12_v3 = vpop.permute.xlu0 %11  }
  0x7d   :  { %14 = vst.msk [vmem:[#allocation0] sm:$0x1] %vm13_vm1, %v12_v3  }
  0x84   :  { %v18_v4 = vld [vmem:[#allocation0] sm:$0x1] }
  0x85   :  { %20 = vst [vmem:[%s40_s1] sm:$0x1] %v18_v4 }

// kernel: basic_block_forward.1
= control target key start
LH: loop header
LB: loop body
LE: loop exit
PB: predicated region body
PF: predicated region fallthrough
CT: control target
= control target key end

     0   :  { %s1835_s15 = smov 0   ;;  %s2107_s0 = inlined_call_operand.vmem [shape: f32[4,8,324], index: 0, kind: input, shape index: {}]   ;;  %s2108_s1 = inlined_call_operand.vmem [shape: f32[3,8,24], index: 1, kind: input, shape index: {}]   ;;  %s2109_s2 = inlined_call_operand.vmem [shape: f32[3,8,24], index: 2, kind: input, shape index: {}]   ;;  %s2110_s3 = inlined_call_operand.vmem [shape: f32[8,2], index: 3, kind: input, shape index: {}]   ;;  %s2111_s4 = inlined_call_operand.vmem [shape: f32[4,8,288], index: 4, kind: output, shape index: {}]  }
   0x1 LB: > { %s1546_s16 = sadd.s32 4294967295, %s1797_s15   ;;  %p1550_p0 = scmp.ge.s32.totalorder %s1797_s15, 1  ;;  %s1797_s15 = sphi %s1835_s15, %s14_s15  }
   0x2   : > { %p162_p1 = scmp.lt.s32.totalorder %s1797_s15, 5 }
   0x4   : > { %p163_p2 = pnand %p1550_p0, %p162_p1 }
   0x5   : > { %p188_p3 = scmp.lt.s32.totalorder (!%p163_p2), %s1546_s16, 3  ;;  %vm273_vm0 = vcmask (!%p163_p2), 261120   ;;  %s1799_s21 = smov (!%p163_p2), 110   ;;  %vm287_vm1 = vcmask (!%p163_p2), 900096   ;;  %v1802_v10 = vmov (!%p163_p2), 0.0|0.0   ;;  %v1803_v12 = vmov (!%p163_p2), 0.0  }
   0x6   : > { %166 = sbr.rel (%p163_p2) target bundleno = 1122 (0x462), region = 36  ;;  %s1800_s22 = smov (!%p163_p2), 92   ;;  %1656 = vmatprep.subr.bf16.mxu1 (!%p163_p2), %v1802_v10  ;;  %440 = vmatprep.mubr.f32.mxu0 (!%p163_p2), %v1803_v12  ;;  %vm2113_vm2 = vmmov (!%p163_p2), 0   ;;  %vm308_vm3 = vcmask (!%p163_p2), 752640   ;;  %v1806_v21 = vmov (!%p163_p2), 0   ;;  %v1915_v22 = vld [vmem:[%s2110_s3] sm:$0xff] (!%p163_p2) }
   0x7   : > { %s1801_s23 = smov (!%p163_p2), 127   ;;  %1604 = vmatprep.mubr.msk.f32.mxu1 (!%p163_p2), %vm2113_vm2, %v1803_v12  ;;  %s1805_s24 = smov (!%p163_p2), 126   ;;  %1758 = vset.pattern.permute.xlu0 (!%p163_p2), %v1806_v21  ;;  %vm2116_vm4 = vcmask (!%p163_p2), 1039360   ;;  %v1556_v43 = vld [vmem:[%s2108_s1 + $0x8] sm:$0xff] (!%p163_p2)  ;;  %vm2115_vm5 = vcmask (!%p163_p2), 195584   ;;  %vm2112_vm6 = vcmask (!%p163_p2), 1031168  }
   0x8   : > { %v317_v55 = vld [vmem:[%s2108_s1] sm:$0xff] (!%p163_p2)  ;;  %vm859_vm12 = vcmask (!%p163_p2), 154624   ;;  %s1807_s7 = smov (!%p163_p2), 19   ;;  %s1809_s8 = smov (!%p163_p2), 109  }
   0x9   : > { %860 = vst.msk [vmem:[#allocation3] sm:$0xff] (!%p163_p2), %vm859_vm12, %v1803_v12 }
   0xd   : > { %s2137_s16 = smov (!%p188_p3, %s1546_s16), 3 }
   0xe   : > { %s1702_s17 = smul.u32 24, %s2137_s16 }
  0x10   : > { %s192_s20 = scalar_lea.vmem %s2107_s0, %s1702_s17 }
  0x11   : > { %v1851_v0 = vld [vmem:[%s192_s20 + $0x8] sm:$0xff]  ;;  %v1853_v1 = vld [vmem:[%s192_s20] sm:$0xff]  ;;  %v1855_v2 = vld [vmem:[%s192_s20 + $0x10] sm:$0xff]  ;;  %s197_s20 = scalar_lea.vmem %s2111_s4, %s1702_s17 }
  0x12   : > { %283 = vrot.lane.b32.xlu0 %v1851_v0, %s1799_s21  ;;  %281 = vrot.lane.b32.xlu1 %v1853_v1, %s1799_s21  ;;  %274 = vst.msk [vmem:[#allocation2 + $0x10] sm:$0xff] %vm273_vm0, %v1855_v2 }
  0x16   : > { %285 = vrot.lane.b32.xlu0 %v1855_v2, %s1799_s21  ;;  %304 = vrot.lane.b32.xlu1 %v1851_v0, %s1800_s22 }
  0x19   : > { %v1867_v3 = vld [vmem:[#allocation2 + $0x10] sm:$0xff] }
  0x1a   : > { %306 = vrot.lane.b32.xlu0 %v1855_v2, %s1800_s22  ;;  %302 = vrot.lane.b32.xlu1 %v1853_v1, %s1800_s22  ;;  %v1728_v4 = vpack.i.bf16 %v1867_v3, %v1851_v0 }
  0x1e   : > { %1729 = vrot.lane.b32.xlu0 %v1728_v4, %s1801_s23 }
  0x84   : > { %v284_v5 = vpop.permute.xlu0 %283  ;;  %v282_v6 = vpop.permute.xlu1 %281 }
  0x85   : > { %v1877_v7 = vsel %vm287_vm1, %v282_v6, %v284_v5 }
  0x86   : > { %v1738_v8 = vpack.i.bf16 %v1877_v7, %v1853_v1  ;;  %v1661_v51 = vpack.c.bf16 %v1877_v7, %v1853_v1 }
  0x88   : > { %v286_v9 = vpop.permute.xlu0 %285  ;;  %1739 = vrot.lane.b32.xlu0 %v1738_v8, %s1801_s23  ;;  %v305_v15 = vpop.permute.xlu1 %304 }
  0x89   : > { %295 = vst.msk [vmem:[#allocation2 + $0x28] sm:$0xff] %vm273_vm0, %v286_v9  ;;  %v1889_v13 = vsel %vm287_vm1, %v284_v5, %v286_v9  ;;  %v1561_v5 = vld [vmem:[%s2108_s1 + $0x10] sm:$0xff] }
  0x8a   : > { %v1659_v48 = vpack.c.bf16 %v1889_v13, %v1851_v0 }
  0x8c   : > { %v307_v11 = vpop.permute.xlu0 %306  ;;  %v303_v19 = vpop.permute.xlu1 %302 }
  0x8d   : > { %316 = vst.msk [vmem:[#allocation2 + $0x40] sm:$0xff] %vm273_vm0, %v307_v11  ;;  %v1898_v18 = vsel %vm308_vm3, %v305_v15, %v307_v11  ;;  %v1904_v20 = vsel %vm308_vm3, %v303_v19, %v305_v15  ;;  %v198_v11 = vlaneseq }
  0x90   : > { %v323_v14 = vld [vmem:[#allocation2 + $0x28] sm:$0xff]  ;;  %v1730_v23 = vpop.permute.xlu0 %1729 }
  0x91   : > { %v1733_v16 = vpack.i.bf16 %v323_v14, %v1889_v13  ;;  %v1732_v25 = vunpack.i.h.bf16 %v1730_v23  ;;  %v1731_v26 = vunpack.i.l.bf16 %v1730_v23  ;;  %v1664_v47 = vpack.c.bf16 %v323_v14, %v1867_v3 }
  0x92   : > { %v199_v13 = vand.u32 127, %v198_v11 }
  0x93   : > { %1734 = vrot.lane.b32.xlu1 %v1733_v16, %s1801_s23  ;;  %v358_v33 = vsel %vm2116_vm4, %v1731_v26, %v1732_v25 }
  0x94   : > { %v1893_v17 = vld [vmem:[#allocation2 + $0x40] sm:$0xff]  ;;  %v201_v14 = vadd.s32 256, %v199_v13 }
  0x95   : > { %354 = vrot.lane.b32.xlu0 %v1893_v17, %s1801_s23 }
  0x96   : > { %v204_v15 = vadd.s32 1, %v201_v14 }
  0x97   : > { %352 = vrot.lane.b32.xlu1 %v1898_v18, %s1801_s23 }
  0x99   : > { %1744 = vrot.lane.b32.xlu0 %v1728_v4, %s1805_s24 }
  0x9b   : > { %350 = vrot.lane.b32.xlu1 %v1904_v20, %s1801_s23 }
  0x9d   : > { %1754 = vrot.lane.b32.xlu0 %v1738_v8, %s1805_s24 }
  0x9f   : > { %1749 = vrot.lane.b32.xlu1 %v1733_v16, %s1805_s24  ;;  %v202_v16 = vadd.s32 1, %v199_v13 }
  0xa1   : > { %679 = vrot.lane.b32.xlu0 %v1893_v17, %s1805_s24 }
  0xa3   : > { %677 = vrot.lane.b32.xlu1 %v1898_v18, %s1805_s24 }
  0xa5   : > { %847 = vperm.xlu0 %1758, %v1915_v22  }
  0xa7   : > { %675 = vrot.lane.b32.xlu1 %v1904_v20, %s1805_s24 }
  0xfa   : > { %v1740_v24 = vpop.permute.xlu0 %1739 }
  0xfb   : > { %v1741_v27 = vunpack.i.l.bf16 %v1740_v24  ;;  %v1742_v29 = vunpack.i.h.bf16 %v1740_v24 }
  0xfd   : > { %v357_v36 = vsel %vm2116_vm4, %v1741_v27, %v1731_v26 }
 0x105   : > { %v1735_v28 = vpop.permute.xlu1 %1734 }
 0x106   : > { %v1737_v30 = vunpack.i.h.bf16 %v1735_v28  ;;  %v1736_v31 = vunpack.i.l.bf16 %v1735_v28 }
 0x107   : > { %v355_v32 = vpop.permute.xlu0 %354 }
 0x108   : > { %v1657_v34 = vpack.c.bf16 %v1737_v30, %v1732_v25  ;;  %v360_v35 = vsel %vm2116_vm4, %v1736_v31, %v1737_v30  ;;  %v359_v37 = vsel %vm2116_vm4, %v1742_v29, %v1736_v31 }
 0x109   : > { %v353_v38 = vpop.permute.xlu1 %352  ;;  %v1652_v39 = vpack.c.bf16 %v360_v35, %v358_v33  ;;  %v1654_v40 = vpack.c.bf16 %v359_v37, %v357_v36 }
 0x10a   : > { %1658 = vmatpush3.bf16.msra.mxu1 %v1657_v34  ;;  %v362_v42 = vsel %vm2116_vm4, %v353_v38, %v355_v32 }
 0x10b   : > { %v1745_v41 = vpop.permute.xlu0 %1744  ;;  %1653 = vmatprep.subr.bf16.mxu0 %v1652_v39  ;;  %1602 = vmatprep.subr.mxu1 %v1803_v12 }
 0x10c   : > { %1655 = vmatpush1.bf16.msra.mxu0 %v1654_v40  ;;  %v1747_v45 = vunpack.i.h.bf16 %v1745_v41  ;;  %v1746_v49 = vunpack.i.l.bf16 %v1745_v41 }
 0x10d   : > { %v351_v44 = vpop.permute.xlu1 %350  ;;  %380 = vmatprep.subr.mxu0 %v362_v42 }
 0x10e   : > { %1603 = vmatpush3.msra.mxu1 %v355_v32  ;;  %v361_v46 = vsel %vm2116_vm4, %v351_v44, %v353_v38  ;;  %v683_v56 = vsel %vm2112_vm6, %v1746_v49, %v1747_v45 }
 0x10f   : > { %1663 = vmatprep.subr.bf16.mxu1 %v1802_v10  ;;  %1605 = vmatmul.mubr.msk.f32.vlgmr.msra.gmra.mrb[0].mxu1 %vm2115_vm5, %v1556_v43  ;;  %v1755_v50 = vpop.permute.xlu0 %1754 }
 0x110   : > { %381 = vmatpush1.msra.mxu0 %v361_v46  ;;  %1665 = vmatpush3.bf16.msra.mxu1 %v1664_v47  ;;  %v1757_v57 = vunpack.i.h.bf16 %v1755_v50  ;;  %v1756_v58 = vunpack.i.l.bf16 %v1755_v50 }
 0x111   : > { %v1750_v52 = vpop.permute.xlu1 %1749  ;;  %1557 = vmatmul.mubr.msk.f32.vlgmr.msra.gmra.mrb[0].mxu0 %vm2115_vm5, %v1556_v43  ;;  %1660 = vmatprep.subr.bf16.mxu0 %v1659_v48 }
 0x112   : > { %v1752_v53 = vunpack.i.h.bf16 %v1750_v52  ;;  %v1751_v54 = vunpack.i.l.bf16 %v1750_v52  ;;  %1662 = vmatpush1.bf16.msra.mxu0 %v1661_v51  ;;  %1611 = vmatprep.subr.mxu1 %v1803_v12  ;;  %v682_v3 = vsel %vm2112_vm6, %v1756_v58, %v1746_v49 }
 0x113   : > { %524 = vmatprep.subr.mxu0 %v1898_v18  ;;  %1613 = vmatprep.mubr.msk.f32.mxu1 %vm2113_vm2, %v1803_v12  ;;  %v680_v6 = vpop.permute.xlu0 %679  ;;  %v1972_v18 = vmul.u32.u64.low 3817748708, %v204_v15  ;;  %v1973_v19 = vmul.u32.u64.high 3817748708, %v204_v15, %v1972_v18 }
 0x114   : > { %v1671_v59 = vpack.c.bf16 %v1752_v53, %v1747_v45  ;;  %1612 = vmatpush3.msra.mxu1 %v1893_v17  ;;  %v685_v60 = vsel %vm2112_vm6, %v1751_v54, %v1752_v53  ;;  %584 = vmatprep.mubr.f32.mxu0 %v1803_v12  ;;  %v684_v61 = vsel %vm2112_vm6, %v1757_v57, %v1751_v54  ;;  %v200_v17 = vadd.s32 128, %v199_v13 }
 0x115   : > { %v678_v62 = vpop.permute.xlu1 %677  ;;  %1670 = vmatprep.subr.bf16.mxu1 %v1802_v10  ;;  %1614 = vmatmul.mubr.msk.f32.vlgmr.msra.gmra.mrb[2].mxu1 %vm2115_vm5, %v317_v55  ;;  %v1666_v63 = vpack.c.bf16 %v685_v60, %v683_v56  ;;  %v1668_v4 = vpack.c.bf16 %v684_v61, %v682_v3  ;;  %v233_v26 = vshrl.u32 %v1973_v19, 4 }
 0x116   : > { %525 = vmatpush1.msra.mxu0 %v1904_v20  ;;  %1672 = vmatpush3.bf16.msra.mxu1 %v1671_v59  ;;  %v687_v8 = vsel %vm2112_vm6, %v678_v62, %v680_v6  ;;  %v1975_v20 = vmul.u32.u64.low 3817748708, %v202_v16  ;;  %v1976_v21 = vmul.u32.u64.high 3817748708, %v202_v16, %v1975_v20  ;;  %v203_v23 = vadd.s32 1, %v200_v17 }
 0x117   : > { %1667 = vmatprep.subr.bf16.mxu0 %v1666_v63  ;;  %1620 = vmatprep.subr.mxu1 %v1803_v12  ;;  %v234_v28 = vmul.u32 18, %v233_v26 }
 0x118   : > { %1622 = vmatprep.mubr.msk.f32.mxu1 %vm2113_vm2, %v1803_v12  ;;  %v1978_v24 = vmul.u32.u64.low 3817748708, %v203_v23  ;;  %v1979_v25 = vmul.u32.u64.high 3817748708, %v203_v23, %v1978_v24  ;;  %v211_v27 = vshrl.u32 %v1976_v21, 4 }
 0x119   : > { %1559 = vmatmul.mubr.msk.f32.vlgmr.msra.gmra.mrb[0].mxu0 %vm2115_vm5, %v317_v55  ;;  %v676_v7 = vpop.permute.xlu1 %675  ;;  %v235_v31 = vsub.s32 %v204_v15, %v234_v28 }
 0x11a   : > { %1669 = vmatpush1.bf16.msra.mxu0 %v1668_v4  ;;  %1621 = vmatpush3.msra.mxu1 %v680_v6  ;;  %v686_v9 = vsel %vm2112_vm6, %v676_v7, %v678_v62  ;;  %v212_v29 = vmul.u32 18, %v211_v27  ;;  %v222_v30 = vshrl.u32 %v1979_v25, 4 }
 0x11b   : > { %704 = vmatprep.subr.mxu0 %v687_v8  ;;  %1623 = vmatmul.mubr.msk.f32.vlgmr.msra.gmra.mrb[4].mxu1 %vm2115_vm5, %v1561_v5  ;;  %vm240_vm7 = vcmp.ne.s32.totalorder %v235_v31, 0  ;;  %vm243_vm8 = vcmp.lt.s32.totalorder %v235_v31, 0  ;;  %v249_v36 = vadd.s32 18, %v235_v31 }
 0x11c   : > { %764 = vmatprep.mubr.f32.mxu0 %v1803_v12  ;;  %1677 = vmatprep.subr.bf16.mxu1 %v1802_v10  ;;  %v213_v34 = vsub.s32 %v202_v16, %v212_v29  ;;  %v223_v35 = vmul.u32 18, %v222_v30  ;;  %vm246_vm9 = vmand %vm243_vm8, %vm240_vm7  ;;  %v1808_v29 = vmov 1  }
 0x11d   : > { %1631 = vmatprep.mubr.msk.f32.mxu1 %vm2113_vm2, %v1803_v12  ;;  %v252_v42 = vsel %vm246_vm9, %v249_v36, %v235_v31  ;;  %vm861_vm9 = vcmask 556424   ;;  %1789 = vset.pattern.permute.xlu1 %v1808_v29 }
 0x11e   : > { %705 = vmatpush1.msra.mxu0 %v686_v9  ;;  %vm238_vm10 = vcmp.ne.s32.totalorder %v213_v34, 0  ;;  %vm241_vm11 = vcmp.lt.s32.totalorder %v213_v34, 0  ;;  %v224_v37 = vsub.s32 %v203_v23, %v223_v35  ;;  %v247_v41 = vadd.s32 18, %v213_v34  ;;  %862 = vst.msk [vmem:[#allocation3 + $0x10] sm:$0xff] %vm861_vm9, %v1803_v12  ;;  %1790 = vset.pattern.permute.xlu0 %v1808_v29 }
 0x11f   : > { %vm244_vm13 = vmand %vm241_vm11, %vm238_vm10  ;;  %vm255_vm6 = vcmp.ge.s32.totalorder %v252_v42, 1  ;;  %vm258_vm2 = vcmp.le.s32.totalorder %v252_v42, 16  ;;  %vm2126_vm9 = vcmask 1031168  }
 0x120   : > { %vm239_vm14 = vcmp.ne.s32.totalorder %v224_v37, 0  ;;  %vm242_vm15 = vcmp.lt.s32.totalorder %v224_v37, 0  ;;  %v250_v43 = vsel %vm244_vm13, %v247_v41, %v213_v34  ;;  %v248_v44 = vadd.s32 18, %v224_v37  ;;  %vm261_vm8 = vmand %vm255_vm6, %vm258_vm2 }
 0x121   : > { %1562 = vmatmul.mubr.msk.f32.vlgmr.msra.gmra.mrb[0].mxu0 %vm2115_vm5, %v1561_v5  ;;  %vm245_vm7 = vmand %vm242_vm15, %vm239_vm14  ;;  %vm253_vm5 = vcmp.ge.s32.totalorder %v250_v43, 1  ;;  %vm256_vm4 = vcmp.le.s32.totalorder %v250_v43, 16  ;;  %v1555_v51 = vsel %vm261_vm8, 1.0, %v1803_v12  ;;  %vm2123_vm15 = vcmask 195584  }
 0x122   : > { %1049 = vmatprep.mubr.f32.mxu0 %v1803_v12  ;;  %v251_v50 = vsel %vm245_vm7, %v248_v44, %v224_v37  ;;  %vm259_vm10 = vmand %vm253_vm5, %vm256_vm4  ;;  %vm877_vm4 = vcmask 1047704   ;;  %vm880_vm5 = vcmask 400384   ;;  %vm2125_vm8 = vmmov 0  }
 0x123   : > { %vm254_vm11 = vcmp.ge.s32.totalorder %v251_v50, 1  ;;  %vm257_vm13 = vcmp.le.s32.totalorder %v251_v50, 16  ;;  %v1553_v57 = vsel %vm259_vm10, 1.0, %v1803_v12  ;;  %vm2124_vm7 = vmmov %vm2123_vm15 }
 0x124   : > { %v848_v46 = vpop.permute.xlu0 %847  ;;  %vm260_vm2 = vmand %vm254_vm11, %vm257_vm13 }
 0x125   : > { %v1554_v62 = vsel %vm260_vm2, 1.0, %v1803_v12  ;;  %vm2127_vm10 = vmmov %vm2126_vm9 }
 0x126   : > { %vm2128_vm11 = vmmov %vm2126_vm9 }
 0x127   : > { %vm2129_vm13 = vmmov %vm2124_vm7 }
 0x128   : > { %vm2130_vm2 = vmmov %vm2126_vm9 }
 0x1e2   : > { %v513_v32 = vpop.f32.mrb[0].mxu1 }
 0x1e3   : > { %v1606_v33 = vpop.f32.mrb[1].mxu1 }
 0x1e8   : > { %v657_v38 = vpop.f32.mrb[2].mxu1 }
 0x1e9   : > { %v658_v39 = vadd.f32 %v657_v38, %v513_v32  ;;  %v1615_v40 = vpop.f32.mrb[3].mxu1 }
 0x1ee   : > { %v837_v45 = vpop.f32.mrb[4].mxu1 }
 0x1ef   : > { %v843_v47 = vadd.f32 %v837_v45, %v658_v39  ;;  %v1624_v48 = vpop.f32.mrb[5].mxu1 }
 0x1f1   : > { %v852_v49 = vadd.f32 %v848_v46, %v843_v47 }
 0x1f3   : > { %v855_v52 = vmax.f32 %v852_v49, 0.0 }
 0x1f4   : > { %v766_v53 = vpop.f32.mrb[0].mxu0 }
 0x1f5   : > { %v850_v54 = vadd.f32 %v848_v46, %v766_v53  ;;  %v768_v55 = vpop.f32.mrb[1].mxu0  ;;  %v858_v56 = vmul.f32 %v1555_v51, %v855_v52 }
 0x1f6   : > { %v851_v58 = vadd.f32 %v848_v46, %v768_v55  ;;  %v1564_v46 = vld [vmem:[%s2109_s2 + $0x8] sm:$0xff] }
 0x1f7   : > { %v853_v59 = vmax.f32 %v850_v54, 0.0  ;;  %870 = vrot.lane.b32.xlu0 %v858_v56, %s1807_s7 }
 0x1f8   : > { %v854_v61 = vmax.f32 %v851_v58, 0.0  ;;  %v928_v58 = vld [vmem:[%s2109_s2] sm:$0xff] }
 0x1f9   : > { %v856_v60 = vmul.f32 %v1553_v57, %v853_v59 }
 0x1fa   : > { %v857_v63 = vmul.f32 %v1554_v62, %v854_v61 }
 0x1fb   : > { %866 = vrot.lane.b32.xlu1 %v856_v60, %s1807_s7 }
 0x1ff   : > { %868 = vrot.lane.b32.xlu1 %v857_v63, %s1807_s7 }
 0x269   : > { %v871_v4 = vpop.permute.xlu0 %870 }
 0x26d   : > { %v867_v3 = vpop.permute.xlu1 %866 }
 0x26e   : > { %878 = vst.msk [vmem:[#allocation3] sm:$0xff] %vm877_vm4, %v867_v3  ;;  %vm2131_vm4 = vmmov %vm2124_vm7 }
 0x271   : > { %v869_v5 = vpop.permute.xlu1 %868 }
 0x272   : > { %v1991_v6 = vsel %vm859_vm12, %v867_v3, %v869_v5  ;;  %v873_v7 = vsel %vm859_vm12, %v869_v5, %v871_v4 }
 0x273   : > { %881 = vst.msk [vmem:[#allocation3 + $0x10] sm:$0xff] %vm880_vm5, %v873_v7  ;;  %896 = vrot.lane.b32.xlu1 %v1991_v6, %s1799_s21  ;;  %vm2132_vm5 = vmmov %vm2130_vm2 }
 0x275   : > { %v1996_v8 = vld [vmem:[#allocation3] sm:$0xff] }
 0x277   : > { %894 = vrot.lane.b32.xlu1 %v1996_v8, %s1799_s21 }
 0x27a   : > { %v884_v9 = vld [vmem:[#allocation3 + $0x10] sm:$0xff] }
 0x27b   : > { %887 = vst.msk [vmem:[#allocation2 + $0x10] sm:$0xff] %vm273_vm0, %v884_v9  ;;  %898 = vrot.lane.b32.xlu0 %v884_v9, %s1799_s21  ;;  %918 = vrot.lane.b32.xlu1 %v884_v9, %s1800_s22 }
 0x27f   : > { %916 = vrot.lane.b32.xlu0 %v1991_v6, %s1800_s22 }
 0x282   : > { %v2005_v11 = vld [vmem:[#allocation2 + $0x10] sm:$0xff] }
 0x283   : > { %914 = vrot.lane.b32.xlu0 %v1996_v8, %s1800_s22  ;;  %v1759_v13 = vpack.i.bf16 %v2005_v11, %v1991_v6 }
 0x285   : > { %1760 = vrot.lane.b32.xlu1 %v1759_v13, %s1801_s23 }
 0x2e5   : > { %v897_v14 = vpop.permute.xlu1 %896 }
 0x2e9   : > { %v895_v15 = vpop.permute.xlu1 %894 }
 0x2ea   : > { %v2013_v16 = vsel %vm287_vm1, %v895_v15, %v897_v14 }
 0x2eb   : > { %v1769_v17 = vpack.i.bf16 %v2013_v16, %v1996_v8  ;;  %v1682_v55 = vpack.c.bf16 %v2013_v16, %v1996_v8  ;;  %v1569_v8 = vld [vmem:[%s2109_s2 + $0x10] sm:$0xff] }
 0x2ed   : > { %v899_v18 = vpop.permute.xlu0 %898  ;;  %v919_v19 = vpop.permute.xlu1 %918  ;;  %1770 = vrot.lane.b32.xlu1 %v1769_v17, %s1801_s23 }
 0x2ee   : > { %907 = vst.msk [vmem:[#allocation2 + $0x28] sm:$0xff] %vm273_vm0, %v899_v18  ;;  %v2020_v20 = vsel %vm287_vm1, %v897_v14, %v899_v18  ;;  %927 = vst.msk [vmem:[#allocation2 + $0x40] sm:$0xff] %vm273_vm0, %v919_v19  ;;  %vm2117_vm0 = vcmask 1039360  }
 0x2ef   : > { %vm2118_vm1 = vmmov %vm2117_vm0  ;;  %v1680_v52 = vpack.c.bf16 %v2020_v20, %v1991_v6 }
 0x2f0   : > { %vm2120_vm6 = vmmov %vm2117_vm0 }
 0x2f1   : > { %v917_v21 = vpop.permute.xlu0 %916  ;;  %vm2121_vm12 = vmmov %vm2117_vm0 }
 0x2f2   : > { %v2024_v23 = vsel %vm308_vm3, %v917_v21, %v919_v19  ;;  %vm2122_vm14 = vmmov %vm2117_vm0 }
 0x2f5   : > { %v915_v24 = vpop.permute.xlu0 %914  ;;  %v934_v25 = vld [vmem:[#allocation2 + $0x28] sm:$0xff]  ;;  %v2026_v26 = vld [vmem:[#allocation2 + $0x40] sm:$0xff] }
 0x2f6   : > { %v2029_v27 = vsel %vm308_vm3, %v915_v24, %v917_v21  ;;  %v1764_v28 = vpack.i.bf16 %v934_v25, %v2020_v20  ;;  %965 = vrot.lane.b32.xlu1 %v2026_v26, %s1801_s23  ;;  %vm2119_vm3 = vmmov %vm2117_vm0  ;;  %v1685_v49 = vpack.c.bf16 %v934_v25, %v2005_v11 }
 0x2f7   : > { %v1761_v30 = vpop.permute.xlu1 %1760 }
 0x2f8   : > { %1765 = vrot.lane.b32.xlu0 %v1764_v28, %s1801_s23  ;;  %v1763_v32 = vunpack.i.h.bf16 %v1761_v30  ;;  %v1762_v33 = vunpack.i.l.bf16 %v1761_v30 }
 0x2fa   : > { %1775 = vrot.lane.b32.xlu1 %v1759_v13, %s1805_s24  ;;  %v968_v39 = vsel %vm2117_vm0, %v1762_v33, %v1763_v32  ;;  %vm2133_vm0 = vmmov %vm2131_vm4 }
 0x2fc   : > { %963 = vrot.lane.b32.xlu0 %v2024_v23, %s1801_s23 }
 0x2fe   : > { %1785 = vrot.lane.b32.xlu1 %v1769_v17, %s1805_s24 }
 0x300   : > { %961 = vrot.lane.b32.xlu0 %v2029_v27, %s1801_s23 }
 0x302   : > { %1288 = vrot.lane.b32.xlu1 %v2026_v26, %s1805_s24 }
 0x304   : > { %1780 = vrot.lane.b32.xlu0 %v1764_v28, %s1805_s24 }
 0x306   : > { %1458 = vperm.xlu1 %1789, %v1915_v22  }
 0x308   : > { %1286 = vrot.lane.b32.xlu0 %v2024_v23, %s1805_s24 }
 0x30a   : > { %1469 = vrot.lane.b32.xlu1 %v1851_v0, %s1809_s8 }
 0x30c   : > { %1284 = vrot.lane.b32.xlu0 %v2029_v27, %s1805_s24 }
 0x310   : > { %1467 = vrot.lane.b32.xlu0 %v1853_v1, %s1809_s8 }
 0x314   : > { %1471 = vrot.lane.b32.xlu0 %v1855_v2, %s1809_s8 }
 0x35f   : > { %v1771_v31 = vpop.permute.xlu1 %1770 }
 0x360   : > { %v1772_v34 = vunpack.i.l.bf16 %v1771_v31  ;;  %v1773_v22 = vunpack.i.h.bf16 %v1771_v31 }
 0x362   : > { %v967_v0 = vsel %vm2119_vm3, %v1772_v34, %v1762_v33  ;;  %vm2135_vm3 = vmmov %vm2133_vm0 }
 0x368   : > { %v966_v35 = vpop.permute.xlu1 %965 }
 0x36a   : > { %v1766_v36 = vpop.permute.xlu0 %1765 }
 0x36b   : > { %v1768_v37 = vunpack.i.h.bf16 %v1766_v36  ;;  %v1767_v38 = vunpack.i.l.bf16 %v1766_v36 }
 0x36c   : > { %v1776_v44 = vpop.permute.xlu1 %1775 }
 0x36d   : > { %v1678_v40 = vpack.c.bf16 %v1768_v37, %v1763_v32  ;;  %v969_v41 = vsel %vm2118_vm1, %v1773_v22, %v1767_v38  ;;  %v970_v1 = vsel %vm2120_vm6, %v1767_v38, %v1768_v37  ;;  %v1778_v50 = vunpack.i.h.bf16 %v1776_v44  ;;  %vm2134_vm1 = vmmov %vm2130_vm2 }
 0x36e   : > { %v1675_v2 = vpack.c.bf16 %v969_v41, %v967_v0  ;;  %v964_v42 = vpop.permute.xlu0 %963  ;;  %v1673_v43 = vpack.c.bf16 %v970_v1, %v968_v39  ;;  %v1777_v51 = vunpack.i.l.bf16 %v1776_v44  ;;  %vm1473_vm6 = vcmask 891904  }
 0x36f   : > { %1679 = vmatpush3.bf16.msra.mxu1 %v1678_v40  ;;  %v972_v45 = vsel %vm2121_vm12, %v964_v42, %v966_v35  ;;  %vm1487_vm12 = vcmask 244736  }
 0x370   : > { %1674 = vmatprep.subr.bf16.mxu0 %v1673_v43  ;;  %1629 = vmatprep.subr.mxu1 %v1803_v12  ;;  %v1786_v53 = vpop.permute.xlu1 %1785  ;;  %v1291_v62 = vsel %vm2126_vm9, %v1777_v51, %v1778_v50 }
 0x371   : > { %1676 = vmatpush1.bf16.msra.mxu0 %v1675_v2  ;;  %v1788_v59 = vunpack.i.h.bf16 %v1786_v53  ;;  %v1787_v60 = vunpack.i.l.bf16 %v1786_v53 }
 0x372   : > { %v962_v47 = vpop.permute.xlu0 %961  ;;  %989 = vmatprep.subr.mxu0 %v972_v45 }
 0x373   : > { %1630 = vmatpush3.msra.mxu1 %v966_v35  ;;  %v971_v48 = vsel %vm2122_vm14, %v962_v47, %v964_v42  ;;  %v1290_v6 = vsel %vm2130_vm2, %v1787_v60, %v1777_v51  ;;  %vm1489_vm14 = vcmask 261360  }
 0x374   : > { %1684 = vmatprep.subr.bf16.mxu1 %v1802_v10  ;;  %1632 = vmatmul.mubr.msk.f32.vlgmr.msra.gmra.mrb[6].mxu1 %vm2123_vm15, %v1564_v46  ;;  %v1289_v9 = vpop.permute.xlu1 %1288 }
 0x375   : > { %1686 = vmatpush3.bf16.msra.mxu1 %v1685_v49  ;;  %990 = vmatpush1.msra.mxu0 %v971_v48 }
 0x376   : > { %v1781_v54 = vpop.permute.xlu0 %1780  ;;  %1638 = vmatprep.subr.mxu1 %v1803_v12  ;;  %1565 = vmatmul.mubr.msk.f32.vlgmr.msra.gmra.mrb[2].mxu0 %vm2124_vm7, %v1564_v46 }
 0x377   : > { %v1783_v56 = vunpack.i.h.bf16 %v1781_v54  ;;  %v1782_v57 = vunpack.i.l.bf16 %v1781_v54  ;;  %1681 = vmatprep.subr.bf16.mxu0 %v1680_v52  ;;  %1640 = vmatprep.mubr.msk.f32.mxu1 %vm2125_vm8, %v1803_v12 }
 0x378   : > { %1683 = vmatpush1.bf16.msra.mxu0 %v1682_v55  ;;  %1193 = vmatprep.mubr.f32.mxu0 %v1803_v12 }
 0x379   : > { %v1692_v61 = vpack.c.bf16 %v1783_v56, %v1778_v50  ;;  %1639 = vmatpush3.msra.mxu1 %v2026_v26  ;;  %1133 = vmatprep.subr.mxu0 %v2024_v23  ;;  %v1293_v63 = vsel %vm2127_vm10, %v1782_v57, %v1783_v56  ;;  %v1292_v3 = vsel %vm2128_vm11, %v1788_v59, %v1782_v57 }
 0x37a   : > { %v1287_v4 = vpop.permute.xlu0 %1286  ;;  %1641 = vmatmul.mubr.msk.f32.vlgmr.msra.gmra.mrb[8].mxu1 %vm2129_vm13, %v928_v58  ;;  %1691 = vmatprep.subr.bf16.mxu1 %v1802_v10  ;;  %v1687_v5 = vpack.c.bf16 %v1293_v63, %v1291_v62  ;;  %v1689_v7 = vpack.c.bf16 %v1292_v3, %v1290_v6 }
 0x37b   : > { %1693 = vmatpush3.bf16.msra.mxu1 %v1692_v61  ;;  %1649 = vmatprep.mubr.msk.f32.mxu1 %vm2125_vm8, %v1803_v12  ;;  %v1295_v11 = vsel %vm2132_vm5, %v1287_v4, %v1289_v9 }
 0x37c   : > { %1134 = vmatpush1.msra.mxu0 %v2029_v27  ;;  %1647 = vmatprep.subr.mxu1 %v1803_v12 }
 0x37d   : > { %1688 = vmatprep.subr.bf16.mxu0 %v1687_v5 }
 0x37e   : > { %1567 = vmatmul.mubr.msk.f32.vlgmr.msra.gmra.mrb[2].mxu0 %vm2131_vm4, %v928_v58  ;;  %v1285_v10 = vpop.permute.xlu0 %1284 }
 0x37f   : > { %1690 = vmatpush1.bf16.msra.mxu0 %v1689_v7  ;;  %1648 = vmatpush3.msra.mxu1 %v1289_v9  ;;  %v1294_v13 = vsel %vm2134_vm1, %v1285_v10, %v1287_v4 }
 0x380   : > { %1312 = vmatprep.subr.mxu0 %v1295_v11  ;;  %1650 = vmatmul.mubr.msk.f32.vlgmr.msra.gmra.mrb[10].mxu1 %vm2133_vm0, %v1569_v8 }
 0x381   : > { %1372 = vmatprep.mubr.f32.mxu0 %v1803_v12 }
 0x382   : > { %v1468_v19 = vpop.permute.xlu0 %1467 }
 0x383   : > { %1313 = vmatpush1.msra.mxu0 %v1294_v13 }
 0x385   : > { %v1459_v20 = vpop.permute.xlu1 %1458 }
 0x386   : > { %1570 = vmatmul.mubr.msk.f32.vlgmr.msra.gmra.mrb[2].mxu0 %vm2135_vm3, %v1569_v8  ;;  %v1472_v25 = vpop.permute.xlu0 %1471 }
 0x389   : > { %v1470_v28 = vpop.permute.xlu1 %1469 }
 0x38a   : > { %v1475_v31 = vsel %vm1473_vm6, %v1470_v28, %v1472_v25  ;;  %v1474_v34 = vsel %vm1473_vm6, %v1468_v19, %v1470_v28 }
 0x447   : > { %v1122_v14 = vpop.f32.mrb[6].mxu1 }
 0x448   : > { %v1633_v15 = vpop.f32.mrb[7].mxu1 }
 0x44d   : > { %v1266_v16 = vpop.f32.mrb[8].mxu1 }
 0x44e   : > { %v1267_v17 = vadd.f32 %v1266_v16, %v1122_v14  ;;  %v1642_v18 = vpop.f32.mrb[9].mxu1 }
 0x453   : > { %v1445_v21 = vpop.f32.mrb[10].mxu1 }
 0x454   : > { %v1451_v23 = vadd.f32 %v1445_v21, %v1267_v17  ;;  %v1651_v24 = vpop.f32.mrb[11].mxu1 }
 0x456   : > { %v1463_v26 = vadd.f32 %v1459_v20, %v1451_v23 }
 0x458   : > { %v1481_v27 = vadd.f32 %v1472_v25, %v1463_v26 }
 0x459   : > { %v1374_v29 = vpop.f32.mrb[2].mxu0 }
 0x45a   : > { %v1484_v30 = vmax.f32 %v1481_v27, 0.0  ;;  %v1461_v32 = vadd.f32 %v1459_v20, %v1374_v29  ;;  %v1376_v33 = vpop.f32.mrb[3].mxu0 }
 0x45b   : > { %v1462_v35 = vadd.f32 %v1459_v20, %v1376_v33 }
 0x45c   : > { %1488 = vst.msk [vmem:[%s197_s20 + $0x10] sm:$0xff] %vm1487_vm12, %v1484_v30  ;;  %v1479_v36 = vadd.f32 %v1474_v34, %v1461_v32 }
 0x45d   : > { %1490 = vst.msk [vmem:[%s197_s20 + $0x10] sm:$0xff] %vm1489_vm14, %v1803_v12  ;;  %v1480_v37 = vadd.f32 %v1475_v31, %v1462_v35 }
 0x45e   : > { %v1482_v38 = vmax.f32 %v1479_v36, 0.0 }
 0x45f   : > { %v1483_v22 = vmax.f32 %v1480_v37, 0.0 }
 0x460   : > { %1485 = vst [vmem:[%s197_s20] sm:$0xff] %v1482_v38 }
 0x461   : > { %1486 = vst [vmem:[%s197_s20 + $0x8] sm:$0xff] %v1483_v22 }
 0x462 PF: > { %s14_s15 = sadd.s32 1, %s1797_s15  }
 0x463   : > { %p11_p4 = scmp.ge.s32.totalorder %s14_s15, 6  }
 0x465   :  { %13 = sbr.rel (!%p11_p4) target bundleno = 1 (0x1), region = 70 }

</bundles_post_ra>
